<compile_context>
chip_gen: v6e
topology: v6e:2x2x1
jax: 0.10.0
libtpu: 0.0.40
codegen_flags: <defaults>
</compile_context>

<pallas_src>
import jax
import jax.numpy as jnp
from jax.experimental import pallas as pl
from jax.experimental.pallas import tpu as pltpu


def _round_up(x, m):
    return ((x + m - 1) // m) * m


# ----------------------------------------------------------------------------
# Pallas kernel (one batch tile per grid step).
#
#   text_ref   : (Bt, Dp)          padded raw text features
#   author_ref : (Bt, Ep)          gathered (padded) author embedding
#   cat_ref    : (Bt, 10*Ep)       gathered+flattened (padded) category embeds
#   page_ref   : (Bt, 1)           page count
#   wt/bt      : (Dp, Ep) / (1, Ep)     text_fc
#   wc/bc      : (10*Ep, Ep) / (1, Ep)  category_fc
#   wp/bp      : (1, Ep) / (1, Ep)      page_count_fc   (K=1 -> VPU broadcast)
#   wo_rows    : (4, Ep)           output_fc weight, one row per concat segment
#   bo         : (1, 1)            output_fc bias
#   out_ref    : (Bt, 1)
# ----------------------------------------------------------------------------
def content_based_kernel(text_ref, author_ref, cat_ref, page_ref,
                         wt_ref, bt_ref, wc_ref, bc_ref, wp_ref, bp_ref,
                         wo_ref, bo_ref, out_ref):
    # text_out = relu(text @ Wt + bt)                      -- MXU
    text_out = jnp.maximum(
        jnp.dot(text_ref[...], wt_ref[...], preferred_element_type=jnp.float32)
        + bt_ref[...], 0.0)

    # author_out = gathered embedding (no ReLU, per spec)
    author_out = author_ref[...]

    # category_out = relu(cat_flat @ Wc + bc)              -- MXU
    cat_out = jnp.maximum(
        jnp.dot(cat_ref[...], wc_ref[...], preferred_element_type=jnp.float32)
        + bc_ref[...], 0.0)

    # page_count_out = relu(page * wp + bp)   (K=1 matmul done on the VPU)
    page_out = jnp.maximum(page_ref[...] * wp_ref[...] + bp_ref[...], 0.0)

    # Fused output projection (N=1): instead of 4 MXU passes, do 4 VPU
    # broadcast-multiplies and a single lane reduction.
    #   out[b] = sum_e ( text*wo0 + author*wo1 + cat*wo2 + page*wo3 )[b,e] + bo
    wo = wo_ref[...]                                    # (4, Ep)
    acc = (text_out * wo[0:1, :]
           + author_out * wo[1:2, :]
           + cat_out * wo[2:3, :]
           + page_out * wo[3:4, :])                     # (Bt, Ep), padded lanes = 0
    out_ref[...] = jnp.sum(acc, axis=-1, keepdims=True) + bo_ref[...]


# ----------------------------------------------------------------------------
# Parameter construction (matches the nn.Module layout) + zero-padding helper.
# ----------------------------------------------------------------------------
def init_params(key, input_dim, author_dim, category_dim, embedding_dim=50,
                n_categories=10):
    keys = jax.random.split(key, 10)
    E = embedding_dim

    def lin(kw, kb, fan_in, fan_out):
        bound = 1.0 / jnp.sqrt(fan_in)
        w = jax.random.uniform(kw, (fan_in, fan_out), jnp.float32, -bound, bound)
        b = jax.random.uniform(kb, (1, fan_out), jnp.float32, -bound, bound)
        return w, b

    wt, bt = lin(keys[0], keys[1], input_dim, E)            # text_fc
    wc, bc = lin(keys[2], keys[3], E * n_categories, E)     # category_fc
    wp, bp = lin(keys[4], keys[5], 1, E)                    # page_count_fc
    wo, bo = lin(keys[6], keys[7], E * 4, 1)                # output_fc

    author_emb = jax.random.normal(keys[8], (author_dim, E), jnp.float32)
    category_emb = jax.random.normal(keys[9], (category_dim, E), jnp.float32)

    return {"wt": wt, "bt": bt, "wc": wc, "bc": bc, "wp": wp, "bp": bp,
            "wo": wo, "bo": bo,
            "author_emb": author_emb, "category_emb": category_emb,
            "n_categories": n_categories}


def pad_params(p):
    """Zero-pad to lane/sublane friendly shapes (exact under ReLU / zero rows)."""
    E = p["author_emb"].shape[1]
    D_in = p["wt"].shape[0]
    n_cat = p["n_categories"]
    Ep = _round_up(E, 64)          # 50 -> 64 ; 10*Ep = 640 = 5*128
    Dp = _round_up(D_in, 8)

    wt = jnp.zeros((Dp, Ep), jnp.float32).at[:D_in, :E].set(p["wt"])
    bt = jnp.zeros((1, Ep), jnp.float32).at[:, :E].set(p["bt"])

    # category_fc rows must follow the padded per-slot stride Ep.
    wc_src = p["wc"].reshape(n_cat, E, E)
    wc = (jnp.zeros((n_cat, Ep, Ep), jnp.float32)
          .at[:, :E, :E].set(wc_src)
          .reshape(n_cat * Ep, Ep))
    bc = jnp.zeros((1, Ep), jnp.float32).at[:, :E].set(p["bc"])

    wp = jnp.zeros((1, Ep), jnp.float32).at[:, :E].set(p["wp"])
    bp = jnp.zeros((1, Ep), jnp.float32).at[:, :E].set(p["bp"])

    # output_fc (4E, 1) -> (4, Ep) rows: [text, author, category, page]
    wo_rows = jnp.zeros((4, Ep), jnp.float32).at[:, :E].set(
        p["wo"][:, 0].reshape(4, E))
    bo = p["bo"]

    author_emb = jnp.zeros((p["author_emb"].shape[0], Ep),
                           jnp.float32).at[:, :E].set(p["author_emb"])
    category_emb = jnp.zeros((p["category_emb"].shape[0], Ep),
                             jnp.float32).at[:, :E].set(p["category_emb"])

    return {"wt": wt, "bt": bt, "wc": wc, "bc": bc, "wp": wp, "bp": bp,
            "wo_rows": wo_rows, "bo": bo,
            "author_emb": author_emb, "category_emb": category_emb,
            "E": E, "Ep": Ep, "D_in": D_in, "Dp": Dp, "n_categories": n_cat}


# ----------------------------------------------------------------------------
# Wrapper: embedding gathers (glue) + batch-tiled pallas_call.
# ----------------------------------------------------------------------------
def content_based_forward(pp, text_features, author_id, category_ids, page_count,
                          block_b=512):
    B = text_features.shape[0]
    E, Ep, D_in, Dp = pp["E"], pp["Ep"], pp["D_in"], pp["Dp"]
    n_cat = pp["n_categories"]

    Bt = _round_up(min(block_b, _round_up(B, 8)), 8)   # batch tile (mult. of 8)
    Bp = _round_up(B, Bt)
    G = Bp // Bt

    # Glue: data-dependent embedding gathers + zero padding of the batch tile.
    # TODO(synk): move these gathers into the kernel (scalar-prefetch ids) to
    #             avoid writing author_e / cat_flat to HBM and reading it back.
    text = jnp.zeros((Bp, Dp), jnp.float32).at[:B, :D_in].set(text_features)
    author_e = jnp.zeros((Bp, Ep), jnp.float32).at[:B].set(
        pp["author_emb"][author_id])
    cat_flat = jnp.zeros((Bp, n_cat * Ep), jnp.float32).at[:B].set(
        pp["category_emb"][category_ids].reshape(B, n_cat * Ep))
    page = jnp.zeros((Bp, 1), jnp.float32).at[:B, 0].set(page_count)

    tile_map = lambda i: (i, 0)     # batch-tiled operands
    const_map = lambda i: (0, 0)    # weights stay VMEM-resident across steps

    in_specs = [
        pl.BlockSpec((Bt, Dp), tile_map),
        pl.BlockSpec((Bt, Ep), tile_map),
        pl.BlockSpec((Bt, n_cat * Ep), tile_map),
        pl.BlockSpec((Bt, 1), tile_map),
        pl.BlockSpec(pp["wt"].shape, const_map),
        pl.BlockSpec(pp["bt"].shape, const_map),
        pl.BlockSpec(pp["wc"].shape, const_map),
        pl.BlockSpec(pp["bc"].shape, const_map),
        pl.BlockSpec(pp["wp"].shape, const_map),
        pl.BlockSpec(pp["bp"].shape, const_map),
        pl.BlockSpec(pp["wo_rows"].shape, const_map),
        pl.BlockSpec(pp["bo"].shape, const_map),
    ]
    out_spec = pl.BlockSpec((Bt, 1), tile_map)

    weight_bytes = 4 * int(pp["wt"].size + pp["wc"].size + pp["wo_rows"].size
                           + 4 * Ep + 1)
    act_bytes = 4 * int(text.size + author_e.size + cat_flat.size + page.size + Bp)
    flops = 2 * Bp * (Dp * Ep + n_cat * Ep * Ep + 4 * Ep)

    out = pl.pallas_call(
        content_based_kernel,
        out_shape=jax.ShapeDtypeStruct((Bp, 1), jnp.float32),
        grid_spec=pltpu.PrefetchScalarGridSpec(
            num_scalar_prefetch=0,
            grid=(G,),
            in_specs=in_specs,
            out_specs=out_spec,
        ),
        compiler_params=pltpu.CompilerParams(
            dimension_semantics=("parallel",),   # megacore sharding on v7x
        ),
        cost_estimate=pl.CostEstimate(flops=flops, transcendentals=0,
                                      bytes_accessed=act_bytes + weight_bytes),
    )(text, author_e, cat_flat, page,
      pp["wt"], pp["bt"], pp["wc"], pp["bc"], pp["wp"], pp["bp"],
      pp["wo_rows"], pp["bo"])

    return out[:B, 0]   # squeeze(1) + drop batch padding


# ----------------------------------------------------------------------------
# Pure-JAX reference on the UNPADDED params (matches the PyTorch forward).
# ----------------------------------------------------------------------------
def reference_forward(params, text_features, author_id, category_ids, page_count):
    B = text_features.shape[0]
    relu = lambda x: jnp.maximum(x, 0.0)
    text_out = relu(text_features @ params["wt"] + params["bt"])
    author_out = params["author_emb"][author_id]
    cat_out = relu(params["category_emb"][category_ids].reshape(B, -1)
                   @ params["wc"] + params["bc"])
    page_out = relu(page_count.reshape(B, 1) @ params["wp"] + params["bp"])
    combined = jnp.concatenate([text_out, author_out, cat_out, page_out], axis=1)
    return (combined @ params["wo"] + params["bo"])[:, 0]


if __name__ == "__main__":
    input_dim, author_dim, category_dim, E, n_cat = 32, 20, 16, 50, 10

    key = jax.random.PRNGKey(0)
    k_p, k_t, k_a, k_c, k_pc, k2_t, k2_a, k2_c, k2_pc = jax.random.split(key, 9)

    params = init_params(k_p, input_dim, author_dim, category_dim, E, n_cat)
    padded = pad_params(params)

    # --- test 1: small batch, single grid step --------------------------------
    B = 8
    text_features = jax.random.normal(k_t, (B, input_dim), jnp.float32)
    author_id = jax.random.randint(k_a, (B,), 0, author_dim, jnp.int32)
    category_ids = jax.random.randint(k_c, (B, n_cat), 0, category_dim, jnp.int32)
    page_count = jax.random.uniform(k_pc, (B,), jnp.float32, 0.0, 500.0)

    out = content_based_forward(padded, text_features, author_id,
                                category_ids, page_count, block_b=512)
    out = jax.block_until_ready(out)
    ref = reference_forward(params, text_features, author_id,
                            category_ids, page_count)
    assert out.shape == (B,)
    assert jnp.allclose(out, ref, rtol=1e-4, atol=1e-3), (out, ref)

    # --- test 2: larger batch, multiple grid steps (exercises the pipeline) ---
    B2 = 64
    text2 = jax.random.normal(k2_t, (B2, input_dim), jnp.float32)
    author2 = jax.random.randint(k2_a, (B2,), 0, author_dim, jnp.int32)
    cats2 = jax.random.randint(k2_c, (B2, n_cat), 0, category_dim, jnp.int32)
    pages2 = jax.random.uniform(k2_pc, (B2,), jnp.float32, 0.0, 500.0)

    out2 = content_based_forward(padded, text2, author2, cats2, pages2,
                                 block_b=16)   # Bt=16 -> grid=(4,)
    out2 = jax.block_until_ready(out2)
    ref2 = reference_forward(params, text2, author2, cats2, pages2)
    assert out2.shape == (B2,)
    assert jnp.allclose(out2, ref2, rtol=1e-4, atol=1e-3), (out2, ref2)

    print("KERNEL_OK")
</pallas_src>

<mosaic_0001>
module attributes {stable_mosaic.version = 11 : i64} {
  func.func @content_based_kernel(%arg0: i32, %arg1: memref<8x32xf32, #tpu.memory_space<vmem>>, %arg2: memref<8x64xf32, #tpu.memory_space<vmem>>, %arg3: memref<8x640xf32, #tpu.memory_space<vmem>>, %arg4: memref<8x1xf32, #tpu.memory_space<vmem>>, %arg5: memref<32x64xf32, #tpu.memory_space<vmem>>, %arg6: memref<1x64xf32, #tpu.memory_space<vmem>>, %arg7: memref<640x64xf32, #tpu.memory_space<vmem>>, %arg8: memref<1x64xf32, #tpu.memory_space<vmem>>, %arg9: memref<1x64xf32, #tpu.memory_space<vmem>>, %arg10: memref<1x64xf32, #tpu.memory_space<vmem>>, %arg11: memref<4x64xf32, #tpu.memory_space<vmem>>, %arg12: memref<1x1xf32, #tpu.memory_space<vmem>>, %arg13: memref<8x1xf32, #tpu.memory_space<vmem>>) attributes {dimension_semantics = [#tpu.dimension_semantics<parallel>], iteration_bounds = array<i64: 1>, scalar_prefetch = 0 : i64, scratch_operands = 0 : i64, tpu.core_type = #tpu.core_type<tc>, window_params = [{transform_indices = @transform_0, window_bounds = array<i64: 8, 32>}, {transform_indices = @transform_1, window_bounds = array<i64: 8, 64>}, {transform_indices = @transform_2, window_bounds = array<i64: 8, 640>}, {transform_indices = @transform_3, window_bounds = array<i64: 8, 1>}, {pipeline_mode = #tpu.pipeline_mode<synchronous>, transform_indices = @transform_4, window_bounds = array<i64: 32, 64>}, {pipeline_mode = #tpu.pipeline_mode<synchronous>, transform_indices = @transform_5, window_bounds = array<i64: 1, 64>}, {pipeline_mode = #tpu.pipeline_mode<synchronous>, transform_indices = @transform_6, window_bounds = array<i64: 640, 64>}, {pipeline_mode = #tpu.pipeline_mode<synchronous>, transform_indices = @transform_7, window_bounds = array<i64: 1, 64>}, {pipeline_mode = #tpu.pipeline_mode<synchronous>, transform_indices = @transform_8, window_bounds = array<i64: 1, 64>}, {pipeline_mode = #tpu.pipeline_mode<synchronous>, transform_indices = @transform_9, window_bounds = array<i64: 1, 64>}, {pipeline_mode = #tpu.pipeline_mode<synchronous>, transform_indices = @transform_10, window_bounds = array<i64: 4, 64>}, {pipeline_mode = #tpu.pipeline_mode<synchronous>, transform_indices = @transform_11, window_bounds = array<i64: 1, 1>}, {transform_indices = @transform_12, window_bounds = array<i64: 8, 1>}]} {
    %c0 = arith.constant 0 : index
    %c0_0 = arith.constant 0 : index
    %0 = vector.load %arg1[%c0, %c0_0] : memref<8x32xf32, #tpu.memory_space<vmem>>, vector<8x32xf32>
    %c0_1 = arith.constant 0 : index
    %c0_2 = arith.constant 0 : index
    %1 = vector.load %arg5[%c0_1, %c0_2] : memref<32x64xf32, #tpu.memory_space<vmem>>, vector<32x64xf32>
    %cst = arith.constant dense<0.000000e+00> : vector<8x64xf32>
    %2 = tpu.matmul %0, %1, %cst {dimension_numbers = #tpu.dot_dimension_numbers<[1], [0], [0], [1], [0, 0, 1, 1], [], []>} : vector<8x32xf32>, vector<32x64xf32>, vector<8x64xf32> -> vector<8x64xf32>
    %c0_3 = arith.constant 0 : index
    %c0_4 = arith.constant 0 : index
    %3 = vector.load %arg6[%c0_3, %c0_4] : memref<1x64xf32, #tpu.memory_space<vmem>>, vector<1x64xf32>
    %4 = vector.broadcast %3 : vector<1x64xf32> to vector<8x64xf32>
    %5 = arith.addf %2, %4 : vector<8x64xf32>
    %cst_5 = arith.constant 0.000000e+00 : f32
    %6 = vector.broadcast %cst_5 : f32 to vector<8x64xf32>
    %7 = arith.maximumf %5, %6 : vector<8x64xf32>
    %c0_6 = arith.constant 0 : index
    %c0_7 = arith.constant 0 : index
    %8 = vector.load %arg2[%c0_6, %c0_7] : memref<8x64xf32, #tpu.memory_space<vmem>>, vector<8x64xf32>
    %c0_8 = arith.constant 0 : index
    %c0_9 = arith.constant 0 : index
    %9 = vector.load %arg3[%c0_8, %c0_9] : memref<8x640xf32, #tpu.memory_space<vmem>>, vector<8x640xf32>
    %c0_10 = arith.constant 0 : index
    %c0_11 = arith.constant 0 : index
    %10 = vector.load %arg7[%c0_10, %c0_11] : memref<640x64xf32, #tpu.memory_space<vmem>>, vector<640x64xf32>
    %cst_12 = arith.constant dense<0.000000e+00> : vector<8x64xf32>
    %11 = tpu.matmul %9, %10, %cst_12 {dimension_numbers = #tpu.dot_dimension_numbers<[1], [0], [0], [1], [0, 0, 1, 1], [], []>} : vector<8x640xf32>, vector<640x64xf32>, vector<8x64xf32> -> vector<8x64xf32>
    %c0_13 = arith.constant 0 : index
    %c0_14 = arith.constant 0 : index
    %12 = vector.load %arg8[%c0_13, %c0_14] : memref<1x64xf32, #tpu.memory_space<vmem>>, vector<1x64xf32>
    %13 = vector.broadcast %12 : vector<1x64xf32> to vector<8x64xf32>
    %14 = arith.addf %11, %13 : vector<8x64xf32>
    %cst_15 = arith.constant 0.000000e+00 : f32
    %15 = vector.broadcast %cst_15 : f32 to vector<8x64xf32>
    %16 = arith.maximumf %14, %15 : vector<8x64xf32>
    %c0_16 = arith.constant 0 : index
    %c0_17 = arith.constant 0 : index
    %17 = vector.load %arg4[%c0_16, %c0_17] : memref<8x1xf32, #tpu.memory_space<vmem>>, vector<8x1xf32>
    %c0_18 = arith.constant 0 : index
    %c0_19 = arith.constant 0 : index
    %18 = vector.load %arg9[%c0_18, %c0_19] : memref<1x64xf32, #tpu.memory_space<vmem>>, vector<1x64xf32>
    %19 = vector.broadcast %17 : vector<8x1xf32> to vector<8x64xf32>
    %20 = vector.broadcast %18 : vector<1x64xf32> to vector<8x64xf32>
    %21 = arith.mulf %19, %20 : vector<8x64xf32>
    %c0_20 = arith.constant 0 : index
    %c0_21 = arith.constant 0 : index
    %22 = vector.load %arg10[%c0_20, %c0_21] : memref<1x64xf32, #tpu.memory_space<vmem>>, vector<1x64xf32>
    %23 = vector.broadcast %22 : vector<1x64xf32> to vector<8x64xf32>
    %24 = arith.addf %21, %23 : vector<8x64xf32>
    %cst_22 = arith.constant 0.000000e+00 : f32
    %25 = vector.broadcast %cst_22 : f32 to vector<8x64xf32>
    %26 = arith.maximumf %24, %25 : vector<8x64xf32>
    %c0_23 = arith.constant 0 : index
    %c0_24 = arith.constant 0 : index
    %27 = vector.load %arg11[%c0_23, %c0_24] : memref<4x64xf32, #tpu.memory_space<vmem>>, vector<4x64xf32>
    %28 = vector.extract_strided_slice %27 {offsets = [0, 0], sizes = [1, 64], strides = [1, 1]} : vector<4x64xf32> to vector<1x64xf32>
    %29 = vector.broadcast %28 : vector<1x64xf32> to vector<8x64xf32>
    %30 = arith.mulf %7, %29 : vector<8x64xf32>
    %31 = vector.extract_strided_slice %27 {offsets = [1, 0], sizes = [1, 64], strides = [1, 1]} : vector<4x64xf32> to vector<1x64xf32>
    %32 = vector.broadcast %31 : vector<1x64xf32> to vector<8x64xf32>
    %33 = arith.mulf %8, %32 : vector<8x64xf32>
    %34 = arith.addf %30, %33 : vector<8x64xf32>
    %35 = vector.extract_strided_slice %27 {offsets = [2, 0], sizes = [1, 64], strides = [1, 1]} : vector<4x64xf32> to vector<1x64xf32>
    %36 = vector.broadcast %35 : vector<1x64xf32> to vector<8x64xf32>
    %37 = arith.mulf %16, %36 : vector<8x64xf32>
    %38 = arith.addf %34, %37 : vector<8x64xf32>
    %39 = vector.extract_strided_slice %27 {offsets = [3, 0], sizes = [1, 64], strides = [1, 1]} : vector<4x64xf32> to vector<1x64xf32>
    %40 = vector.broadcast %39 : vector<1x64xf32> to vector<8x64xf32>
    %41 = arith.mulf %26, %40 : vector<8x64xf32>
    %42 = arith.addf %38, %41 : vector<8x64xf32>
    %cst_25 = arith.constant dense<0.000000e+00> : vector<8xf32>
    %43 = vector.multi_reduction <add>, %42, %cst_25 [1] : vector<8x64xf32> to vector<8xf32>
    %44 = vector.shape_cast %43 : vector<8xf32> to vector<8x1xf32>
    %c0_26 = arith.constant 0 : index
    %c0_27 = arith.constant 0 : index
    %45 = vector.load %arg12[%c0_26, %c0_27] : memref<1x1xf32, #tpu.memory_space<vmem>>, vector<1x1xf32>
    %46 = vector.broadcast %45 : vector<1x1xf32> to vector<8x1xf32>
    %47 = arith.addf %44, %46 : vector<8x1xf32>
    %c0_28 = arith.constant 0 : index
    %c0_29 = arith.constant 0 : index
    %48 = vector.load %arg13[%c0_28, %c0_29] : memref<8x1xf32, #tpu.memory_space<vmem>>, vector<8x1xf32>
    tpu.vector_store %arg13[%c0_28, %c0_29], %47 {strides = array<i32>} : memref<8x1xf32, #tpu.memory_space<vmem>>, vector<8x1xf32>,
    return
  }
  func.func @transform_0(%arg0: i32) -> (i32, i32) {
    %c0_i32 = arith.constant 0 : i32
    %c0_i32_0 = arith.constant 0 : i32
    return %arg0, %c0_i32 : i32, i32
  }
  func.func @transform_1(%arg0: i32) -> (i32, i32) {
    %c0_i32 = arith.constant 0 : i32
    %c0_i32_0 = arith.constant 0 : i32
    return %arg0, %c0_i32 : i32, i32
  }
  func.func @transform_2(%arg0: i32) -> (i32, i32) {
    %c0_i32 = arith.constant 0 : i32
    %c0_i32_0 = arith.constant 0 : i32
    return %arg0, %c0_i32 : i32, i32
  }
  func.func @transform_3(%arg0: i32) -> (i32, i32) {
    %c0_i32 = arith.constant 0 : i32
    %c0_i32_0 = arith.constant 0 : i32
    return %arg0, %c0_i32 : i32, i32
  }
  func.func @transform_4(%arg0: i32) -> (i32, i32) {
    %c0_i32 = arith.constant 0 : i32
    %c0_i32_0 = arith.constant 0 : i32
    %c0_i32_1 = arith.constant 0 : i32
    return %c0_i32, %c0_i32_0 : i32, i32
  }
  func.func @transform_5(%arg0: i32) -> (i32, i32) {
    %c0_i32 = arith.constant 0 : i32
    %c0_i32_0 = arith.constant 0 : i32
    %c0_i32_1 = arith.constant 0 : i32
    return %c0_i32, %c0_i32_0 : i32, i32
  }
  func.func @transform_6(%arg0: i32) -> (i32, i32) {
    %c0_i32 = arith.constant 0 : i32
    %c0_i32_0 = arith.constant 0 : i32
    %c0_i32_1 = arith.constant 0 : i32
    return %c0_i32, %c0_i32_0 : i32, i32
  }
  func.func @transform_7(%arg0: i32) -> (i32, i32) {
    %c0_i32 = arith.constant 0 : i32
    %c0_i32_0 = arith.constant 0 : i32
    %c0_i32_1 = arith.constant 0 : i32
    return %c0_i32, %c0_i32_0 : i32, i32
  }
  func.func @transform_8(%arg0: i32) -> (i32, i32) {
    %c0_i32 = arith.constant 0 : i32
    %c0_i32_0 = arith.constant 0 : i32
    %c0_i32_1 = arith.constant 0 : i32
    return %c0_i32, %c0_i32_0 : i32, i32
  }
  func.func @transform_9(%arg0: i32) -> (i32, i32) {
    %c0_i32 = arith.constant 0 : i32
    %c0_i32_0 = arith.constant 0 : i32
    %c0_i32_1 = arith.constant 0 : i32
    return %c0_i32, %c0_i32_0 : i32, i32
  }
  func.func @transform_10(%arg0: i32) -> (i32, i32) {
    %c0_i32 = arith.constant 0 : i32
    %c0_i32_0 = arith.constant 0 : i32
    %c0_i32_1 = arith.constant 0 : i32
    return %c0_i32, %c0_i32_0 : i32, i32
  }
  func.func @transform_11(%arg0: i32) -> (i32, i32) {
    %c0_i32 = arith.constant 0 : i32
    %c0_i32_0 = arith.constant 0 : i32
    %c0_i32_1 = arith.constant 0 : i32
    return %c0_i32, %c0_i32_0 : i32, i32
  }
  func.func @transform_12(%arg0: i32) -> (i32, i32) {
    %c0_i32 = arith.constant 0 : i32
    %c0_i32_0 = arith.constant 0 : i32
    return %arg0, %c0_i32 : i32, i32
  }
}

</mosaic_0001>

<bundles_post_ra>
// kernel: tpu_custom_call.1
= control target key start
LH: loop header
LB: loop body
LE: loop exit
PB: predicated region body
PF: predicated region fallthrough
CT: control target
= control target key end

     0   :  { %v647_v0 = vmov 0.0   ;;  %vm648_vm0 = vmmov 0   ;;  %vm55_vm1 = vcmask 261120   ;;  %vm481_vm2 = vcmask 523264   ;;  %s1036_s4 = inlined_call_operand.vmem [shape: f32[32,64], index: 4, kind: input, shape index: {}]   ;;  %s1037_s6 = inlined_call_operand.vmem [shape: f32[640,64], index: 6, kind: input, shape index: {}]   ;;  %s1038_s0 = inlined_call_operand.vmem [shape: f32[8,32], index: 0, kind: input, shape index: {}]   ;;  %s1039_s2 = inlined_call_operand.vmem [shape: f32[8,640], index: 2, kind: input, shape index: {}]   ;;  %s1040_s3 = inlined_call_operand.vmem [shape: f32[8,1], index: 3, kind: input, shape index: {}]   ;;  %s1041_s11 = inlined_call_operand.<no memory space> [shape: f32[1,1], index: 11, kind: input, shape index: {}]   ;;  %s1042_s5 = inlined_call_operand.vmem [shape: f32[1,64], index: 5, kind: input, shape index: {}]   ;;  %s1043_s8 = inlined_call_operand.vmem [shape: f32[1,64], index: 8, kind: input, shape index: {}]   ;;  %s1044_s10 = inlined_call_operand.vmem [shape: f32[4,64], index: 10, kind: input, shape index: {}]   ;;  %s1045_s7 = inlined_call_operand.vmem [shape: f32[1,64], index: 7, kind: input, shape index: {}]   ;;  %s1046_s9 = inlined_call_operand.vmem [shape: f32[1,64], index: 9, kind: input, shape index: {}]   ;;  %s1047_s1 = inlined_call_operand.vmem [shape: f32[8,64], index: 1, kind: input, shape index: {}]   ;;  %s1048_s12 = inlined_call_operand.vmem [shape: f32[8,1], index: 12, kind: output, shape index: {}]  }
   0x1   :  { %597 = vmatprep.subr.mxu0 %v647_v0  ;;  %v47_v1 = vld [vmem:[%s1036_s4 + $0x18] sm:$0xff]  ;;  %605 = vmatprep.mubr.msk.f32.mxu0 %vm648_vm0, %v647_v0  ;;  %v46_v4 = vld [vmem:[%s1036_s4 + $0x10] sm:$0xff]  ;;  %v45_v7 = vld [vmem:[%s1036_s4 + $0x8] sm:$0xff]  ;;  %vm493_vm3 = vcmask 7168  }
   0x2   :  { %v167_v2 = vld [vmem:[%s1037_s6 + $0xf8] sm:$0xff]  ;;  %598 = vmatpush3.msra.mxu0 %v47_v1  ;;  %v166_v5 = vld [vmem:[%s1037_s6 + $0xf0] sm:$0xff]  ;;  %v165_v8 = vld [vmem:[%s1037_s6 + $0xe8] sm:$0xff] }
   0x3   :  { %v151_v3 = vld [vmem:[%s1037_s6 + $0x78] sm:$0xff]  ;;  %510 = vmatprep.subr.mxu1 %v167_v2  ;;  %v150_v6 = vld [vmem:[%s1037_s6 + $0x70] sm:$0xff]  ;;  %599 = vmatprep.subr.mxu0 %v647_v0  ;;  %v149_v9 = vld [vmem:[%s1037_s6 + $0x68] sm:$0xff] }
   0x4   :  { %511 = vmatpush3.msra.mxu1 %v151_v3  ;;  %600 = vmatpush3.msra.mxu0 %v46_v4  ;;  %v44_v10 = vld [vmem:[%s1036_s4] sm:$0xff]  ;;  %v199_v13 = vld [vmem:[%s1037_s6 + $0x1f8] sm:$0xff]  ;;  %v198_v18 = vld [vmem:[%s1037_s6 + $0x1f0] sm:$0xff] }
   0x5   :  { %512 = vmatprep.subr.mxu1 %v166_v5  ;;  %601 = vmatprep.subr.mxu0 %v647_v0  ;;  %v164_v11 = vld [vmem:[%s1037_s6 + $0xe0] sm:$0xff]  ;;  %v163_v15 = vld [vmem:[%s1037_s6 + $0xd8] sm:$0xff]  ;;  %v162_v19 = vld [vmem:[%s1037_s6 + $0xd0] sm:$0xff] }
   0x6   :  { %513 = vmatpush3.msra.mxu1 %v150_v6  ;;  %602 = vmatpush3.msra.mxu0 %v45_v7  ;;  %v148_v12 = vld [vmem:[%s1037_s6 + $0x60] sm:$0xff]  ;;  %v183_v16 = vld [vmem:[%s1037_s6 + $0x178] sm:$0xff]  ;;  %v182_v20 = vld [vmem:[%s1037_s6 + $0x170] sm:$0xff] }
   0x7   :  { %514 = vmatprep.subr.mxu1 %v165_v8  ;;  %603 = vmatprep.subr.mxu0 %v647_v0  ;;  %v43_v14 = vld [vmem:[%s1038_s0] sm:$0xff]  ;;  %v147_v17 = vld [vmem:[%s1037_s6 + $0x58] sm:$0xff]  ;;  %v146_v21 = vld [vmem:[%s1037_s6 + $0x50] sm:$0xff] }
   0x8   :  { %515 = vmatpush3.msra.mxu1 %v149_v9  ;;  %604 = vmatpush3.msra.mxu0 %v44_v10  ;;  %v197_v22 = vld [vmem:[%s1037_s6 + $0x1e8] sm:$0xff]  ;;  %v196_v26 = vld [vmem:[%s1037_s6 + $0x1e0] sm:$0xff]  ;;  %v195_v30 = vld [vmem:[%s1037_s6 + $0x1d8] sm:$0xff] }
   0x9   :  { %516 = vmatprep.subr.mxu1 %v164_v11  ;;  %545 = vmatprep.subr.mxu0 %v199_v13  ;;  %v161_v23 = vld [vmem:[%s1037_s6 + $0xc8] sm:$0xff]  ;;  %v160_v27 = vld [vmem:[%s1037_s6 + $0xc0] sm:$0xff]  ;;  %v159_v31 = vld [vmem:[%s1037_s6 + $0xb8] sm:$0xff] }
   0xa   :  { %517 = vmatpush3.msra.mxu1 %v148_v12  ;;  %606 = vmatmul.mubr.msk.f32.vlgmr.msra.gmra.mxu0 %vm55_vm1, %v43_v14  ;;  %v181_v24 = vld [vmem:[%s1037_s6 + $0x168] sm:$0xff]  ;;  %v180_v28 = vld [vmem:[%s1037_s6 + $0x160] sm:$0xff]  ;;  %v179_v32 = vld [vmem:[%s1037_s6 + $0x158] sm:$0xff] }
   0xb   :  { %518 = vmatprep.subr.mxu1 %v163_v15  ;;  %546 = vmatpush3.msra.mxu0 %v183_v16  ;;  %v145_v25 = vld [vmem:[%s1037_s6 + $0x48] sm:$0xff]  ;;  %v144_v29 = vld [vmem:[%s1037_s6 + $0x40] sm:$0xff]  ;;  %v143_v33 = vld [vmem:[%s1037_s6 + $0x38] sm:$0xff] }
   0xc   :  { %519 = vmatpush3.msra.mxu1 %v147_v17  ;;  %547 = vmatprep.subr.mxu0 %v198_v18  ;;  %v194_v34 = vld [vmem:[%s1037_s6 + $0x1d0] sm:$0xff]  ;;  %v193_v38 = vld [vmem:[%s1037_s6 + $0x1c8] sm:$0xff]  ;;  %v192_v42 = vld [vmem:[%s1037_s6 + $0x1c0] sm:$0xff]  ;;  %v649_v18 = vmov 0  }
   0xd   :  { %520 = vmatprep.subr.mxu1 %v162_v19  ;;  %548 = vmatpush3.msra.mxu0 %v182_v20  ;;  %v158_v35 = vld [vmem:[%s1037_s6 + $0xb0] sm:$0xff]  ;;  %v157_v39 = vld [vmem:[%s1037_s6 + $0xa8] sm:$0xff]  ;;  %v156_v43 = vld [vmem:[%s1037_s6 + $0xa0] sm:$0xff] }
   0xe   :  { %521 = vmatpush3.msra.mxu1 %v146_v21  ;;  %549 = vmatprep.subr.mxu0 %v197_v22  ;;  %v178_v36 = vld [vmem:[%s1037_s6 + $0x150] sm:$0xff]  ;;  %v177_v40 = vld [vmem:[%s1037_s6 + $0x148] sm:$0xff]  ;;  %v176_v44 = vld [vmem:[%s1037_s6 + $0x140] sm:$0xff] }
   0xf   :  { %522 = vmatprep.subr.mxu1 %v161_v23  ;;  %550 = vmatpush3.msra.mxu0 %v181_v24  ;;  %v142_v37 = vld [vmem:[%s1037_s6 + $0x30] sm:$0xff]  ;;  %v141_v41 = vld [vmem:[%s1037_s6 + $0x28] sm:$0xff]  ;;  %v140_v45 = vld [vmem:[%s1037_s6 + $0x20] sm:$0xff] }
  0x10   :  { %523 = vmatpush3.msra.mxu1 %v145_v25  ;;  %551 = vmatprep.subr.mxu0 %v196_v26  ;;  %v191_v46 = vld [vmem:[%s1037_s6 + $0x1b8] sm:$0xff]  ;;  %v190_v50 = vld [vmem:[%s1037_s6 + $0x1b0] sm:$0xff]  ;;  %v189_v54 = vld [vmem:[%s1037_s6 + $0x1a8] sm:$0xff] }
  0x11   :  { %524 = vmatprep.subr.mxu1 %v160_v27  ;;  %552 = vmatpush3.msra.mxu0 %v180_v28  ;;  %v155_v47 = vld [vmem:[%s1037_s6 + $0x98] sm:$0xff]  ;;  %v154_v51 = vld [vmem:[%s1037_s6 + $0x90] sm:$0xff]  ;;  %v153_v55 = vld [vmem:[%s1037_s6 + $0x88] sm:$0xff] }
  0x12   :  { %525 = vmatpush3.msra.mxu1 %v144_v29  ;;  %553 = vmatprep.subr.mxu0 %v195_v30  ;;  %v175_v48 = vld [vmem:[%s1037_s6 + $0x138] sm:$0xff]  ;;  %v174_v52 = vld [vmem:[%s1037_s6 + $0x130] sm:$0xff]  ;;  %v173_v56 = vld [vmem:[%s1037_s6 + $0x128] sm:$0xff]  ;;  %v17_v30 = vstv %s1041_s11 }
  0x13   :  { %526 = vmatprep.subr.mxu1 %v159_v31  ;;  %554 = vmatpush3.msra.mxu0 %v179_v32  ;;  %v139_v49 = vld [vmem:[%s1037_s6 + $0x18] sm:$0xff]  ;;  %v138_v53 = vld [vmem:[%s1037_s6 + $0x10] sm:$0xff]  ;;  %v137_v57 = vld [vmem:[%s1037_s6 + $0x8] sm:$0xff]  ;;  %18 = vst [vmem:[#allocation2] sm:$0x1] %v17_v30 }
  0x14   :  { %527 = vmatpush3.msra.mxu1 %v143_v33  ;;  %555 = vmatprep.subr.mxu0 %v194_v34  ;;  %v188_v58 = vld [vmem:[%s1037_s6 + $0x1a0] sm:$0xff]  ;;  %v132_v62 = vld [vmem:[%s1039_s2 + $0x8] sm:$0xff]  ;;  %v187_v63 = vld [vmem:[%s1037_s6 + $0x198] sm:$0xff]  ;;  %v458_v33 = vlaneseq }
  0x15   :  { %528 = vmatprep.subr.mxu1 %v158_v35  ;;  %556 = vmatpush3.msra.mxu0 %v178_v36  ;;  %v152_v59 = vld [vmem:[%s1037_s6 + $0x80] sm:$0xff]  ;;  %v171_v2 = vld [vmem:[%s1037_s6 + $0x118] sm:$0xff]  ;;  %v186_v3 = vld [vmem:[%s1037_s6 + $0x190] sm:$0xff] }
  0x16   :  { %529 = vmatpush3.msra.mxu1 %v142_v37  ;;  %557 = vmatprep.subr.mxu0 %v193_v38  ;;  %v172_v60 = vld [vmem:[%s1037_s6 + $0x120] sm:$0xff]  ;;  %v215_v4 = vld [vmem:[%s1037_s6 + $0x278] sm:$0xff]  ;;  %v170_v5 = vld [vmem:[%s1037_s6 + $0x110] sm:$0xff]  ;;  %v459_v35 = vshrl.u32 %v458_v33, 7 }
  0x17   :  { %530 = vmatprep.subr.mxu1 %v157_v39  ;;  %558 = vmatpush3.msra.mxu0 %v177_v40  ;;  %v136_v61 = vld [vmem:[%s1037_s6] sm:$0xff]  ;;  %v185_v6 = vld [vmem:[%s1037_s6 + $0x188] sm:$0xff]  ;;  %v214_v7 = vld [vmem:[%s1037_s6 + $0x270] sm:$0xff] }
  0x18   :  { %531 = vmatpush3.msra.mxu1 %v141_v41  ;;  %559 = vmatprep.subr.mxu0 %v192_v42  ;;  %v131_v1 = vld [vmem:[%s1039_s2] sm:$0xff]  ;;  %v169_v8 = vld [vmem:[%s1037_s6 + $0x108] sm:$0xff]  ;;  %v134_v12 = vld [vmem:[%s1039_s2 + $0x18] sm:$0xff]  ;;  %v460_v40 = vsub.s32 0, %v459_v35  ;;  %v465_v41 = vsub.s32 1, %v459_v35 }
  0x19   :  { %532 = vmatprep.subr.mxu1 %v156_v43  ;;  %560 = vmatpush3.msra.mxu0 %v176_v44  ;;  %v184_v9 = vld [vmem:[%s1037_s6 + $0x180] sm:$0xff]  ;;  %v213_v10 = vld [vmem:[%s1037_s6 + $0x268] sm:$0xff]  ;;  %v133_v13 = vld [vmem:[%s1039_s2 + $0x10] sm:$0xff] }
  0x1a   :  { %533 = vmatpush3.msra.mxu1 %v140_v45  ;;  %561 = vmatprep.subr.mxu0 %v191_v46  ;;  %v168_v11 = vld [vmem:[%s1037_s6 + $0x100] sm:$0xff]  ;;  %v211_v15 = vld [vmem:[%s1037_s6 + $0x258] sm:$0xff]  ;;  %v210_v17 = vld [vmem:[%s1037_s6 + $0x250] sm:$0xff] }
  0x1b   :  { %534 = vmatprep.subr.mxu1 %v155_v47  ;;  %562 = vmatpush3.msra.mxu0 %v175_v48  ;;  %v212_v14 = vld [vmem:[%s1037_s6 + $0x260] sm:$0xff]  ;;  %v209_v19 = vld [vmem:[%s1037_s6 + $0x248] sm:$0xff]  ;;  %v207_v21 = vld [vmem:[%s1037_s6 + $0x238] sm:$0xff] }
  0x1c   :  { %535 = vmatpush3.msra.mxu1 %v139_v49  ;;  %563 = vmatprep.subr.mxu0 %v190_v50  ;;  %v434_v16 = vld [vmem:[%s1040_s3] sm:$0xff]  ;;  %v206_v22 = vld [vmem:[%s1037_s6 + $0x230] sm:$0xff]  ;;  %v205_v23 = vld [vmem:[%s1037_s6 + $0x228] sm:$0xff] }
  0x1d   :  { %536 = vmatprep.subr.mxu1 %v154_v51  ;;  %564 = vmatpush3.msra.mxu0 %v174_v52  ;;  %v208_v20 = vld [vmem:[%s1037_s6 + $0x240] sm:$0xff]  ;;  %v203_v25 = vld [vmem:[%s1037_s6 + $0x218] sm:$0xff]  ;;  %v202_v26 = vld [vmem:[%s1037_s6 + $0x210] sm:$0xff]  ;;  %v471_v52 = vsub.s32 2, %v459_v35 }
  0x1e   :  { %537 = vmatpush3.msra.mxu1 %v138_v53  ;;  %565 = vmatprep.subr.mxu0 %v189_v54  ;;  %v204_v24 = vld [vmem:[%s1037_s6 + $0x220] sm:$0xff]  ;;  %v201_v27 = vld [vmem:[%s1037_s6 + $0x208] sm:$0xff] }
  0x1f   :  { %538 = vmatprep.subr.mxu1 %v153_v55  ;;  %566 = vmatpush3.msra.mxu0 %v173_v56  ;;  %v200_v28 = vld [vmem:[%s1037_s6 + $0x200] sm:$0xff] }
  0x20   :  { %539 = vmatpush3.msra.mxu1 %v137_v57  ;;  %567 = vmatprep.subr.mxu0 %v188_v58  ;;  %v135_v29 = vld [vmem:[%s1039_s2 + $0x20] sm:$0xff]  ;;  %v477_v57 = vsub.s32 3, %v459_v35 }
  0x21   :  { %540 = vmatprep.subr.mxu1 %v152_v59  ;;  %568 = vmatpush3.msra.mxu0 %v172_v60  ;;  %v499_v37 = vld [vmem:[%s1042_s5] ss:$0 sm:$0xff] }
  0x22   :  { %541 = vmatpush3.msra.mxu1 %v136_v61  ;;  %287 = vmatprep.mubr.f32.mxu1 %v132_v62  ;;  %v457_v44 = vld [vmem:[%s1044_s10] sm:$0xf] }
  0x23   :  { %569 = vmatprep.subr.mxu0 %v187_v63  ;;  %288 = vmatmul.mubr.f32.vlgmr.msra.gmra.mxu1 %v131_v1  ;;  %v501_v47 = vld [vmem:[%s1045_s7] ss:$0 sm:$0xff]  ;;  %v461_v50 = vrot.slane %v457_v44, %v460_v40  ;;  %v466_v51 = vrot.slane %v457_v44, %v465_v41  ;;  %v472_v61 = vrot.slane %v457_v44, %v471_v52 }
  0x24   :  { %570 = vmatpush3.msra.mxu0 %v171_v2  ;;  %608 = vmatprep.subr.mxu1 %v647_v0  ;;  %v503_v48 = vld [vmem:[%s1046_s9] ss:$0 sm:$0xff]  ;;  %v478_v2 = vrot.slane %v457_v44, %v477_v57 }
  0x25   :  { %571 = vmatprep.subr.mxu0 %v186_v3  ;;  %609 = vmatpush3.msra.mxu1 %v215_v4  ;;  %v130_v54 = vld [vmem:[%s1047_s1] sm:$0xff] }
  0x26   :  { %572 = vmatpush3.msra.mxu0 %v170_v5  ;;  %610 = vmatprep.subr.mxu1 %v647_v0  ;;  %v467_v59 = vmul.f32 %v466_v51, %v130_v54 }
  0x27   :  { %573 = vmatprep.subr.mxu0 %v185_v6  ;;  %611 = vmatpush3.msra.mxu1 %v214_v7 }
  0x28   :  { %574 = vmatpush3.msra.mxu0 %v169_v8  ;;  %612 = vmatprep.subr.mxu1 %v647_v0 }
  0x29   :  { %575 = vmatprep.subr.mxu0 %v184_v9  ;;  %613 = vmatpush3.msra.mxu1 %v213_v10 }
  0x2a   :  { %576 = vmatpush3.msra.mxu0 %v168_v11  ;;  %357 = vmatprep.mubr.f32.mxu0 %v134_v12  ;;  %v504_v11 = vld [vmem:[#allocation2] ss:$0 sm:$0xff] }
  0x2b   :  { %614 = vmatprep.subr.mxu1 %v647_v0  ;;  %358 = vmatmul.mubr.f32.vlgmr.msra.gmra.mxu0 %v133_v13 }
  0x2c   :  { %615 = vmatpush3.msra.mxu1 %v212_v14  ;;  %640 = vmatprep.mubr.msk.f32.mxu1 %vm648_vm0, %v647_v0 }
  0x2d   :  { %616 = vmatprep.subr.mxu1 %v647_v0  ;;  %646 = vset.pattern.permute.xlu0 %v649_v18 }
  0x2e   :  { %617 = vmatpush3.msra.mxu1 %v211_v15  ;;  %438 = vperm.xlu0 %646, %v434_v16  }
  0x2f   :  { %618 = vmatprep.subr.mxu1 %v647_v0 }
  0x30   :  { %619 = vmatpush3.msra.mxu1 %v210_v17 }
  0x31   :  { %620 = vmatprep.subr.mxu1 %v647_v0 }
  0x32   :  { %621 = vmatpush3.msra.mxu1 %v209_v19 }
  0x33   :  { %622 = vmatprep.subr.mxu1 %v647_v0 }
  0x34   :  { %623 = vmatpush3.msra.mxu1 %v208_v20 }
  0x35   :  { %624 = vmatprep.subr.mxu1 %v647_v0 }
  0x36   :  { %625 = vmatpush3.msra.mxu1 %v207_v21 }
  0x37   :  { %626 = vmatprep.subr.mxu1 %v647_v0 }
  0x38   :  { %627 = vmatpush3.msra.mxu1 %v206_v22 }
  0x39   :  { %628 = vmatprep.subr.mxu1 %v647_v0 }
  0x3a   :  { %629 = vmatpush3.msra.mxu1 %v205_v23 }
  0x3b   :  { %630 = vmatprep.subr.mxu1 %v647_v0 }
  0x3c   :  { %631 = vmatpush3.msra.mxu1 %v204_v24 }
  0x3d   :  { %632 = vmatprep.subr.mxu1 %v647_v0 }
  0x3e   :  { %633 = vmatpush3.msra.mxu1 %v203_v25 }
  0x3f   :  { %634 = vmatprep.subr.mxu1 %v647_v0 }
  0x40   :  { %635 = vmatpush3.msra.mxu1 %v202_v26 }
  0x41   :  { %636 = vmatprep.subr.mxu1 %v647_v0 }
  0x42   :  { %637 = vmatpush3.msra.mxu1 %v201_v27 }
  0x43   :  { %638 = vmatprep.subr.mxu1 %v647_v0  ;;  %v502_v0 = vld [vmem:[%s1043_s8] ss:$0 sm:$0xff] }
  0x44   :  { %639 = vmatpush3.msra.mxu1 %v200_v28 }
  0x45   :  { %641 = vmatmul.mubr.f32.vlgmr.msra.gmra.mxu1 %v135_v29 }
  0xa9   :  { %v439_v39 = vpop.permute.xlu0 %438 }
  0xaa   :  { %v447_v46 = vmul.f32 %v502_v0, %v439_v39 }
  0xac   :  { %v455_v56 = vadd.f32 %v503_v48, %v447_v46 }
  0xae   :  { %v456_v63 = vmax.f32 %v455_v56, 0.0 }
  0xb0   :  { %v479_v7 = vmul.f32 %v478_v2, %v456_v63 }
  0xca   :  { %v125_v31 = vpop.f32.mrf.mxu0 }
  0xcb   :  { %v126_v43 = vadd.f32 %v499_v37, %v125_v31 }
  0xcc   :  { %v607_v32 = vpop.f32.mrf.mxu0 }
  0xcd   :  { %v129_v53 = vmax.f32 %v126_v43, 0.0 }
  0xcf   :  { %v462_v62 = vmul.f32 %v461_v50, %v129_v53 }
  0xd1   :  { %v468_v5 = vadd.f32 %v467_v59, %v462_v62 }
  0xe3   :  { %v542_v34 = vpop.f32.mrf.mxu1 }
  0xe5   :  { %v543_v38 = vpop.f32.mrf.mxu1 }
  0xe6   :  { %v544_v45 = vadd.f32 %v543_v38, %v542_v34 }
  0xe8   :  { %v290_v55 = vadd.f32 %v544_v45, %v501_v47 }
  0xeb   :  { %v577_v36 = vpop.f32.mrf.mxu0 }
  0xed   :  { %v578_v42 = vpop.f32.mrf.mxu0 }
  0xee   :  { %v579_v49 = vadd.f32 %v578_v42, %v577_v36 }
  0xf0   :  { %v360_v58 = vadd.f32 %v579_v49, %v290_v55 }
 0x105   :  { %v429_v60 = vpop.f32.mrf.mxu1 }
 0x106   :  { %v430_v1 = vadd.f32 %v429_v60, %v360_v58 }
 0x107   :  { %v642_v3 = vpop.f32.mrf.mxu1 }
 0x108   :  { %v433_v4 = vmax.f32 %v430_v1, 0.0 }
 0x10a   :  { %v473_v6 = vmul.f32 %v472_v61, %v433_v4 }
 0x10c   :  { %v474_v8 = vadd.f32 %v473_v6, %v468_v5 }
 0x10e   :  { %v480_v9 = vadd.f32 %v479_v7, %v474_v8 }
 0x110   :  { %v482_v10 = vsel %vm481_vm2, %v480_v9, 0.0 }
 0x111   :  { %483 = vadd.xlane.f32.xlu0 %v482_v10 }
 0x19a   :  { %v484_v12 = vpop.xlane.xlu0 %483 }
 0x19b   :  { %v492_v13 = vadd.f32 %v504_v11, %v484_v12 }
 0x19d   :  { %494 = vst.msk [vmem:[%s1048_s12] sm:$0xff] %vm493_vm3, %v492_v13 }

</bundles_post_ra>
